<compile_context>
chip_gen: v6e
topology: v6e:2x2x1
jax: 0.10.0
libtpu: 0.0.40
codegen_flags: <defaults>
</compile_context>

<pallas_src>
import math
import jax
import jax.numpy as jnp
from jax.experimental import pallas as pl
from jax.experimental.pallas import tpu as pltpu

# ---- small shapes consistent with the module ----
H = 32        # hidden_size
V = 20        # output_size (target vocabulary)
L_DE = 1      # decoder input length (typical single-step decoding)
L_EN = 8      # encoder sequence length (attention memory)
B = 2         # batch


# ----------------------------------------------------------------------------
# Fused decoder kernel
# ----------------------------------------------------------------------------
def make_decoder_kernel(use_attention, L_de, batch, hidden, vocab):
    N = L_de * batch                       # rows, ordered (l * B + b) == (L_de, B, H) row-major
    cdims = (((1,), (1,)), ((), ()))       # contract last dim of both operands

    def kernel(*refs):
        if use_attention:
            (tok_ref, emb_ref, enc_ref, hid_ref,
             wih_ref, whh_ref, bih_ref, bhh_ref,
             wout_ref, bout_ref,
             logp_ref, hid_out_ref) = refs
        else:
            (tok_ref, emb_ref, hid_ref,
             wih_ref, whh_ref, bih_ref, bhh_ref,
             wout_ref, bout_ref,
             logp_ref, hid_out_ref) = refs
            enc_ref = None

        # --- embedding lookup fused as a one-hot matmul on the MXU ---
        tok = tok_ref[...]                                               # (N, 1) int32
        iota = jax.lax.broadcasted_iota(jnp.int32, (N, vocab), 1)
        onehot = jnp.where(tok == iota, 1.0, 0.0).astype(jnp.float32)    # (N, V)
        emb = jnp.dot(onehot, emb_ref[...],
                      preferred_element_type=jnp.float32)                # (N, H)

        # --- optional attention over encoder outputs (faithful to the torch code:
        #     bmm -> softmax(dim=1) -> transpose -> matmul -> reshape(L_de, B, -1)) ---
        if use_attention:
            ctx_rows = []
            for b in range(batch):                                       # static, tiny B
                e_b = enc_ref[b]                                         # (L_en, H)
                if L_de == 1:
                    emb_b = emb[b:b + 1, :]                              # (1, H)
                else:
                    emb_b = emb.reshape(L_de, batch, hidden)[:, b, :]    # (L_de, H)
                scores = jax.lax.dot_general(
                    e_b, emb_b, cdims,
                    preferred_element_type=jnp.float32)                  # (L_en, L_de)
                m = jnp.max(scores, axis=0, keepdims=True)
                p = jnp.exp(scores - m)
                denom = jnp.sum(p, axis=0, keepdims=True)
                att_w = p * pl.reciprocal(denom, approx=True)            # softmax over L_en
                # ctx_b[l, h] = sum_k att_w[k, l] * e_b[k, h]
                ctx_b = jax.lax.dot_general(
                    att_w, e_b, (((0,), (0,)), ((), ())),
                    preferred_element_type=jnp.float32)                  # (L_de, H)
                ctx_rows.append(ctx_b)
            # concatenation along batch reproduces torch's
            # (B, L_de, H).reshape(L_de, B, -1) raw-buffer reinterpretation exactly.
            emb = jnp.concatenate(ctx_rows, axis=0)                      # (N, H)

        # --- ReLU ---
        x = jnp.maximum(emb, 0.0)

        # --- single-layer GRU over L_de time steps (base assumed nn.GRU) ---
        wih = wih_ref[...]                                               # (3H, H)
        whh = whh_ref[...]                                               # (3H, H)
        bih = bih_ref[...]                                               # (1, 3H)
        bhh = bhh_ref[...]                                               # (1, 3H)
        h = hid_ref[...].astype(jnp.float32)                             # (B, H)
        out0 = None
        for t in range(L_de):                                            # static, unrolled
            x_t = x[t * batch:(t + 1) * batch, :]                        # (B, H)
            gi = jax.lax.dot_general(x_t, wih, cdims,
                                     preferred_element_type=jnp.float32) + bih
            gh = jax.lax.dot_general(h, whh, cdims,
                                     preferred_element_type=jnp.float32) + bhh
            r = jax.nn.sigmoid(gi[:, 0:hidden] + gh[:, 0:hidden])
            z = jax.nn.sigmoid(gi[:, hidden:2 * hidden] + gh[:, hidden:2 * hidden])
            n = jnp.tanh(gi[:, 2 * hidden:3 * hidden]
                         + r * gh[:, 2 * hidden:3 * hidden])
            h = (1.0 - z) * n + z * h
            if t == 0:
                out0 = h                                                 # GRU output at step 0

        # --- output Linear + log_softmax(dim=1) epilogue, fused in-kernel ---
        logits = jax.lax.dot_general(out0, wout_ref[...], cdims,
                                     preferred_element_type=jnp.float32) + bout_ref[...]
        m = jnp.max(logits, axis=1, keepdims=True)
        s = logits - m
        lse = jnp.log(jnp.sum(jnp.exp(s), axis=1, keepdims=True))
        logp_ref[...] = s - lse                                          # (B, V)
        hid_out_ref[...] = h                                             # (B, H)

    return kernel


# ----------------------------------------------------------------------------
# Wrapper
# ----------------------------------------------------------------------------
def decoder_forward(x_tokens, hidden, emb_table, gru_params, out_params,
                    encoder_out=None, use_attention=False):
    """x_tokens: (L_de, B) int32; hidden: (1, B, H); encoder_out: (L_en, B, H).
    Returns (log_probs (B, V), hidden (1, B, H))."""
    assert hidden is not None, 'Hidden state is required for decoder'
    L_de, batch = x_tokens.shape
    vocab, hid = emb_table.shape
    wih, whh, bih, bhh = gru_params
    wout, bout = out_params

    tok_flat = x_tokens.reshape(L_de * batch, 1).astype(jnp.int32)       # metadata reshape
    h0 = hidden[0]                                                       # (B, H)

    inputs = [tok_flat, emb_table]
    if use_attention:
        assert encoder_out is not None, 'Encoder output is required for attention'
        # mirrors torch's encoder_out.permute(1, 0, 2); tiny one-time input transpose
        inputs.append(jnp.transpose(encoder_out, (1, 0, 2)))             # (B, L_en, H)
    inputs += [h0, wih, whh, bih, bhh, wout, bout]

    vmem = pl.BlockSpec(memory_space=pltpu.MemorySpace.VMEM)
    kernel = make_decoder_kernel(use_attention, L_de, batch, hid, vocab)

    logp, h_out = pl.pallas_call(
        kernel,
        out_shape=(jax.ShapeDtypeStruct((batch, vocab), jnp.float32),
                   jax.ShapeDtypeStruct((batch, hid), jnp.float32)),
        in_specs=[vmem] * len(inputs),
        out_specs=(vmem, vmem),
    )(*inputs)

    return logp, h_out[None]                                             # (B, V), (1, B, H)


# ----------------------------------------------------------------------------
# Deterministic parameter init (PyTorch-style)
# ----------------------------------------------------------------------------
def xavier_uniform(key, shape):
    fan_out, fan_in = shape
    bound = math.sqrt(6.0 / (fan_in + fan_out))
    return jax.random.uniform(key, shape, jnp.float32, -bound, bound)


def init_params(key):
    k_emb, k_ih, k_hh, k_bi, k_bh, k_out = jax.random.split(key, 6)
    emb_table = xavier_uniform(k_emb, (V, H))
    s = 1.0 / math.sqrt(H)
    wih = jax.random.uniform(k_ih, (3 * H, H), jnp.float32, -s, s)
    whh = jax.random.uniform(k_hh, (3 * H, H), jnp.float32, -s, s)
    bih = jax.random.uniform(k_bi, (1, 3 * H), jnp.float32, -s, s)
    bhh = jax.random.uniform(k_bh, (1, 3 * H), jnp.float32, -s, s)
    wout = xavier_uniform(k_out, (V, H))
    bout = jnp.zeros((1, V), jnp.float32)                                # out.bias.data.fill_(0)
    return emb_table, (wih, whh, bih, bhh), (wout, bout)


# ----------------------------------------------------------------------------
# Demo
# ----------------------------------------------------------------------------
if __name__ == "__main__":
    key = jax.random.PRNGKey(0)
    k_par, k_tok, k_hid, k_enc = jax.random.split(key, 4)

    emb_table, gru_params, out_params = init_params(k_par)

    x = jax.random.randint(k_tok, (L_DE, B), 0, V, dtype=jnp.int32)      # decoder tokens
    hidden = jax.random.normal(k_hid, (1, B, H), jnp.float32) * 0.1      # required hidden state
    encoder_out = jax.random.normal(k_enc, (L_EN, B, H), jnp.float32) * 0.1

    logp, h_out = decoder_forward(x, hidden, emb_table, gru_params, out_params,
                                  encoder_out=encoder_out, use_attention=True)
    jax.block_until_ready((logp, h_out))

    assert logp.shape == (B, V)
    assert h_out.shape == (1, B, H)
    # mirrors `if torch.isnan(output[0]).any(): raise ValueError(...)` (host-side)
    if bool(jnp.isnan(logp[0]).any()):
        raise ValueError('NaN detected in output')
    assert bool(jnp.all(jnp.isfinite(logp)))
    assert bool(jnp.all(jnp.isfinite(h_out)))
    # log_softmax rows must exponentiate to probability distributions
    assert bool(jnp.all(jnp.abs(jnp.sum(jnp.exp(logp), axis=1) - 1.0) < 1e-4))
    print("KERNEL_OK")
</pallas_src>

<mosaic_0001>
module attributes {stable_mosaic.version = 11 : i64} {
  func.func @kernel(%arg0: memref<2x1xi32, #tpu.memory_space<vmem>>, %arg1: memref<20x32xf32, #tpu.memory_space<vmem>>, %arg2: memref<2x8x32xf32, #tpu.memory_space<vmem>>, %arg3: memref<2x32xf32, #tpu.memory_space<vmem>>, %arg4: memref<96x32xf32, #tpu.memory_space<vmem>>, %arg5: memref<96x32xf32, #tpu.memory_space<vmem>>, %arg6: memref<1x96xf32, #tpu.memory_space<vmem>>, %arg7: memref<1x96xf32, #tpu.memory_space<vmem>>, %arg8: memref<20x32xf32, #tpu.memory_space<vmem>>, %arg9: memref<1x20xf32, #tpu.memory_space<vmem>>, %arg10: memref<2x20xf32, #tpu.memory_space<vmem>>, %arg11: memref<2x32xf32, #tpu.memory_space<vmem>>) attributes {dimension_semantics = [], scalar_prefetch = 0 : i64, scratch_operands = 0 : i64, tpu.core_type = #tpu.core_type<tc>} {
    %c0 = arith.constant 0 : index
    %c0_0 = arith.constant 0 : index
    %0 = vector.load %arg0[%c0, %c0_0] : memref<2x1xi32, #tpu.memory_space<vmem>>, vector<2x1xi32>
    %1 = tpu.iota {dimensions = array<i32: 1>} : vector<2x20xi32>
    %2 = vector.broadcast %0 : vector<2x1xi32> to vector<2x20xi32>
    %3 = arith.cmpi eq, %2, %1 : vector<2x20xi32>
    %cst = arith.constant 1.000000e+00 : f32
    %cst_1 = arith.constant 0.000000e+00 : f32
    %4 = vector.broadcast %cst : f32 to vector<2x20xf32>
    %5 = vector.broadcast %cst_1 : f32 to vector<2x20xf32>
    %6 = arith.select %3, %4, %5 : vector<2x20xi1>, vector<2x20xf32>
    %c0_2 = arith.constant 0 : index
    %c0_3 = arith.constant 0 : index
    %7 = vector.load %arg1[%c0_2, %c0_3] : memref<20x32xf32, #tpu.memory_space<vmem>>, vector<20x32xf32>
    %cst_4 = arith.constant dense<0.000000e+00> : vector<2x32xf32>
    %8 = tpu.matmul %6, %7, %cst_4 {dimension_numbers = #tpu.dot_dimension_numbers<[1], [0], [0], [1], [0, 0, 1, 1], [], []>} : vector<2x20xf32>, vector<20x32xf32>, vector<2x32xf32> -> vector<2x32xf32>
    %c0_5 = arith.constant 0 : index
    %c0_6 = arith.constant 0 : index
    %c0_7 = arith.constant 0 : index
    %9 = vector.load %arg2[%c0_5, %c0_6, %c0_7] : memref<2x8x32xf32, #tpu.memory_space<vmem>>, vector<1x8x32xf32>
    %10 = vector.shape_cast %9 : vector<1x8x32xf32> to vector<8x32xf32>
    %11 = vector.extract_strided_slice %8 {offsets = [0, 0], sizes = [1, 32], strides = [1, 1]} : vector<2x32xf32> to vector<1x32xf32>
    %cst_8 = arith.constant dense<0.000000e+00> : vector<8x1xf32>
    %12 = tpu.matmul %10, %11, %cst_8 {dimension_numbers = #tpu.dot_dimension_numbers<[1], [1], [0], [0], [0, 0, 1, 0], [], []>} : vector<8x32xf32>, vector<1x32xf32>, vector<8x1xf32> -> vector<8x1xf32>
    %cst_9 = arith.constant dense<0xFF800000> : vector<1xf32>
    %13 = vector.multi_reduction <maximumf>, %12, %cst_9 [0] : vector<8x1xf32> to vector<1xf32>
    %14 = vector.shape_cast %13 : vector<1xf32> to vector<1x1xf32>
    %15 = vector.broadcast %14 : vector<1x1xf32> to vector<8x1xf32>
    %16 = arith.subf %12, %15 : vector<8x1xf32>
    %17 = math.exp %16 : vector<8x1xf32>
    %cst_10 = arith.constant dense<0.000000e+00> : vector<1xf32>
    %18 = vector.multi_reduction <add>, %17, %cst_10 [0] : vector<8x1xf32> to vector<1xf32>
    %19 = vector.shape_cast %18 : vector<1xf32> to vector<1x1xf32>
    %20 = tpu.reciprocal %19 {approx = true} : vector<1x1xf32> -> vector<1x1xf32>
    %21 = vector.broadcast %20 : vector<1x1xf32> to vector<8x1xf32>
    %22 = arith.mulf %17, %21 : vector<8x1xf32>
    %cst_11 = arith.constant dense<0.000000e+00> : vector<1x32xf32>
    %23 = tpu.matmul %22, %10, %cst_11 {dimension_numbers = #tpu.dot_dimension_numbers<[0], [0], [1], [1], [0, 1, 1, 1], [], []>} : vector<8x1xf32>, vector<8x32xf32>, vector<1x32xf32> -> vector<1x32xf32>
    %c1 = arith.constant 1 : index
    %c0_12 = arith.constant 0 : index
    %c0_13 = arith.constant 0 : index
    %24 = vector.load %arg2[%c1, %c0_12, %c0_13] : memref<2x8x32xf32, #tpu.memory_space<vmem>>, vector<1x8x32xf32>
    %25 = vector.shape_cast %24 : vector<1x8x32xf32> to vector<8x32xf32>
    %26 = vector.extract_strided_slice %8 {offsets = [1, 0], sizes = [1, 32], strides = [1, 1]} : vector<2x32xf32> to vector<1x32xf32>
    %cst_14 = arith.constant dense<0.000000e+00> : vector<8x1xf32>
    %27 = tpu.matmul %25, %26, %cst_14 {dimension_numbers = #tpu.dot_dimension_numbers<[1], [1], [0], [0], [0, 0, 1, 0], [], []>} : vector<8x32xf32>, vector<1x32xf32>, vector<8x1xf32> -> vector<8x1xf32>
    %cst_15 = arith.constant dense<0xFF800000> : vector<1xf32>
    %28 = vector.multi_reduction <maximumf>, %27, %cst_15 [0] : vector<8x1xf32> to vector<1xf32>
    %29 = vector.shape_cast %28 : vector<1xf32> to vector<1x1xf32>
    %30 = vector.broadcast %29 : vector<1x1xf32> to vector<8x1xf32>
    %31 = arith.subf %27, %30 : vector<8x1xf32>
    %32 = math.exp %31 : vector<8x1xf32>
    %cst_16 = arith.constant dense<0.000000e+00> : vector<1xf32>
    %33 = vector.multi_reduction <add>, %32, %cst_16 [0] : vector<8x1xf32> to vector<1xf32>
    %34 = vector.shape_cast %33 : vector<1xf32> to vector<1x1xf32>
    %35 = tpu.reciprocal %34 {approx = true} : vector<1x1xf32> -> vector<1x1xf32>
    %36 = vector.broadcast %35 : vector<1x1xf32> to vector<8x1xf32>
    %37 = arith.mulf %32, %36 : vector<8x1xf32>
    %cst_17 = arith.constant dense<0.000000e+00> : vector<1x32xf32>
    %38 = tpu.matmul %37, %25, %cst_17 {dimension_numbers = #tpu.dot_dimension_numbers<[0], [0], [1], [1], [0, 1, 1, 1], [], []>} : vector<8x1xf32>, vector<8x32xf32>, vector<1x32xf32> -> vector<1x32xf32>
    %39 = tpu.concatenate %23, %38 in 0 : vector<1x32xf32>, vector<1x32xf32> -> vector<2x32xf32>
    %cst_18 = arith.constant 0.000000e+00 : f32
    %40 = vector.broadcast %cst_18 : f32 to vector<2x32xf32>
    %41 = arith.maximumf %39, %40 : vector<2x32xf32>
    %c0_19 = arith.constant 0 : index
    %c0_20 = arith.constant 0 : index
    %42 = vector.load %arg4[%c0_19, %c0_20] : memref<96x32xf32, #tpu.memory_space<vmem>>, vector<96x32xf32>
    %c0_21 = arith.constant 0 : index
    %c0_22 = arith.constant 0 : index
    %43 = vector.load %arg5[%c0_21, %c0_22] : memref<96x32xf32, #tpu.memory_space<vmem>>, vector<96x32xf32>
    %c0_23 = arith.constant 0 : index
    %c0_24 = arith.constant 0 : index
    %44 = vector.load %arg6[%c0_23, %c0_24] : memref<1x96xf32, #tpu.memory_space<vmem>>, vector<1x96xf32>
    %c0_25 = arith.constant 0 : index
    %c0_26 = arith.constant 0 : index
    %45 = vector.load %arg7[%c0_25, %c0_26] : memref<1x96xf32, #tpu.memory_space<vmem>>, vector<1x96xf32>
    %c0_27 = arith.constant 0 : index
    %c0_28 = arith.constant 0 : index
    %46 = vector.load %arg3[%c0_27, %c0_28] : memref<2x32xf32, #tpu.memory_space<vmem>>, vector<2x32xf32>
    %cst_29 = arith.constant dense<0.000000e+00> : vector<2x96xf32>
    %47 = tpu.matmul %41, %42, %cst_29 {dimension_numbers = #tpu.dot_dimension_numbers<[1], [1], [0], [0], [0, 0, 1, 0], [], []>} : vector<2x32xf32>, vector<96x32xf32>, vector<2x96xf32> -> vector<2x96xf32>
    %48 = vector.broadcast %44 : vector<1x96xf32> to vector<2x96xf32>
    %49 = arith.addf %47, %48 : vector<2x96xf32>
    %cst_30 = arith.constant dense<0.000000e+00> : vector<2x96xf32>
    %50 = tpu.matmul %46, %43, %cst_30 {dimension_numbers = #tpu.dot_dimension_numbers<[1], [1], [0], [0], [0, 0, 1, 0], [], []>} : vector<2x32xf32>, vector<96x32xf32>, vector<2x96xf32> -> vector<2x96xf32>
    %51 = vector.broadcast %45 : vector<1x96xf32> to vector<2x96xf32>
    %52 = arith.addf %50, %51 : vector<2x96xf32>
    %53 = vector.extract_strided_slice %49 {offsets = [0, 0], sizes = [2, 32], strides = [1, 1]} : vector<2x96xf32> to vector<2x32xf32>
    %54 = vector.extract_strided_slice %52 {offsets = [0, 0], sizes = [2, 32], strides = [1, 1]} : vector<2x96xf32> to vector<2x32xf32>
    %55 = arith.addf %53, %54 : vector<2x32xf32>
    %56 = arith.negf %55 : vector<2x32xf32>
    %57 = math.exp %56 : vector<2x32xf32>
    %cst_31 = arith.constant 1.000000e+00 : f32
    %58 = vector.broadcast %cst_31 : f32 to vector<2x32xf32>
    %59 = arith.addf %58, %57 : vector<2x32xf32>
    %60 = arith.divf %58, %59 : vector<2x32xf32>
    %61 = vector.extract_strided_slice %49 {offsets = [0, 32], sizes = [2, 32], strides = [1, 1]} : vector<2x96xf32> to vector<2x32xf32>
    %62 = vector.extract_strided_slice %52 {offsets = [0, 32], sizes = [2, 32], strides = [1, 1]} : vector<2x96xf32> to vector<2x32xf32>
    %63 = arith.addf %61, %62 : vector<2x32xf32>
    %64 = arith.negf %63 : vector<2x32xf32>
    %65 = math.exp %64 : vector<2x32xf32>
    %cst_32 = arith.constant 1.000000e+00 : f32
    %66 = vector.broadcast %cst_32 : f32 to vector<2x32xf32>
    %67 = arith.addf %66, %65 : vector<2x32xf32>
    %68 = arith.divf %66, %67 : vector<2x32xf32>
    %69 = vector.extract_strided_slice %49 {offsets = [0, 64], sizes = [2, 32], strides = [1, 1]} : vector<2x96xf32> to vector<2x32xf32>
    %70 = vector.extract_strided_slice %52 {offsets = [0, 64], sizes = [2, 32], strides = [1, 1]} : vector<2x96xf32> to vector<2x32xf32>
    %71 = arith.mulf %60, %70 : vector<2x32xf32>
    %72 = arith.addf %69, %71 : vector<2x32xf32>
    %73 = math.tanh %72 : vector<2x32xf32>
    %cst_33 = arith.constant 1.000000e+00 : f32
    %74 = vector.broadcast %cst_33 : f32 to vector<2x32xf32>
    %75 = arith.subf %74, %68 : vector<2x32xf32>
    %76 = arith.mulf %75, %73 : vector<2x32xf32>
    %77 = arith.mulf %68, %46 : vector<2x32xf32>
    %78 = arith.addf %76, %77 : vector<2x32xf32>
    %c0_34 = arith.constant 0 : index
    %c0_35 = arith.constant 0 : index
    %79 = vector.load %arg8[%c0_34, %c0_35] : memref<20x32xf32, #tpu.memory_space<vmem>>, vector<20x32xf32>
    %cst_36 = arith.constant dense<0.000000e+00> : vector<2x20xf32>
    %80 = tpu.matmul %78, %79, %cst_36 {dimension_numbers = #tpu.dot_dimension_numbers<[1], [1], [0], [0], [0, 0, 1, 0], [], []>} : vector<2x32xf32>, vector<20x32xf32>, vector<2x20xf32> -> vector<2x20xf32>
    %c0_37 = arith.constant 0 : index
    %c0_38 = arith.constant 0 : index
    %81 = vector.load %arg9[%c0_37, %c0_38] : memref<1x20xf32, #tpu.memory_space<vmem>>, vector<1x20xf32>
    %82 = vector.broadcast %81 : vector<1x20xf32> to vector<2x20xf32>
    %83 = arith.addf %80, %82 : vector<2x20xf32>
    %cst_39 = arith.constant dense<0xFF800000> : vector<2xf32>
    %84 = vector.multi_reduction <maximumf>, %83, %cst_39 [1] : vector<2x20xf32> to vector<2xf32>
    %85 = vector.shape_cast %84 : vector<2xf32> to vector<2x1xf32>
    %86 = vector.broadcast %85 : vector<2x1xf32> to vector<2x20xf32>
    %87 = arith.subf %83, %86 : vector<2x20xf32>
    %88 = math.exp %87 : vector<2x20xf32>
    %cst_40 = arith.constant dense<0.000000e+00> : vector<2xf32>
    %89 = vector.multi_reduction <add>, %88, %cst_40 [1] : vector<2x20xf32> to vector<2xf32>
    %90 = vector.shape_cast %89 : vector<2xf32> to vector<2x1xf32>
    %91 = math.log %90 : vector<2x1xf32>
    %92 = vector.broadcast %91 : vector<2x1xf32> to vector<2x20xf32>
    %93 = arith.subf %87, %92 : vector<2x20xf32>
    %c0_41 = arith.constant 0 : index
    %c0_42 = arith.constant 0 : index
    %94 = vector.load %arg10[%c0_41, %c0_42] : memref<2x20xf32, #tpu.memory_space<vmem>>, vector<2x20xf32>
    tpu.vector_store %arg10[%c0_41, %c0_42], %93 {strides = array<i32>} : memref<2x20xf32, #tpu.memory_space<vmem>>, vector<2x20xf32>,
    %c0_43 = arith.constant 0 : index
    %c0_44 = arith.constant 0 : index
    %95 = vector.load %arg11[%c0_43, %c0_44] : memref<2x32xf32, #tpu.memory_space<vmem>>, vector<2x32xf32>
    tpu.vector_store %arg11[%c0_43, %c0_44], %78 {strides = array<i32>} : memref<2x32xf32, #tpu.memory_space<vmem>>, vector<2x32xf32>,
    return
  }
}

</mosaic_0001>

<bundles_post_ra>
// kernel: tpu_custom_call.1
= control target key start
LH: loop header
LB: loop body
LE: loop exit
PB: predicated region body
PF: predicated region fallthrough
CT: control target
= control target key end

     0   :  { %17 = vsyncpa [#allocation3], 0  ;;  %v1054_v2 = vmov 0   ;;  %v1055_v3 = vmov 0.0   ;;  %vm54_vm0 = vcmask 1043456   ;;  %s1323_s0 = inlined_call_operand.vmem [shape: s32[2,1], index: 0, kind: input, shape index: {}]   ;;  %s1324_s1 = inlined_call_operand.vmem [shape: f32[20,32], index: 1, kind: input, shape index: {}]   ;;  %s1325_s2 = inlined_call_operand.vmem [shape: f32[2,8,32], index: 2, kind: input, shape index: {}]   ;;  %s1326_s3 = inlined_call_operand.vmem [shape: f32[2,32], index: 3, kind: input, shape index: {}]   ;;  %s1327_s4 = inlined_call_operand.vmem [shape: f32[96,32], index: 4, kind: input, shape index: {}]   ;;  %s1328_s5 = inlined_call_operand.vmem [shape: f32[96,32], index: 5, kind: input, shape index: {}]   ;;  %s1329_s6 = inlined_call_operand.vmem [shape: f32[1,96], index: 6, kind: input, shape index: {}]   ;;  %s1330_s7 = inlined_call_operand.vmem [shape: f32[1,96], index: 7, kind: input, shape index: {}]   ;;  %s1331_s8 = inlined_call_operand.vmem [shape: f32[20,32], index: 8, kind: input, shape index: {}]   ;;  %s1332_s9 = inlined_call_operand.vmem [shape: f32[1,20], index: 9, kind: input, shape index: {}]   ;;  %s1333_s10 = inlined_call_operand.hbm [shape: f32[2,20], index: 10, kind: output, shape index: {0}]   ;;  %s1334_s11 = inlined_call_operand.hbm [shape: f32[2,32], index: 11, kind: output, shape index: {1}]  }
   0x1   :  { %v39_v0 = vld [vmem:[%s1323_s0] sm:$0x3]  ;;  %v49_v1 = vld [vmem:[%s1324_s1 + $0x10] sm:$0xf]  ;;  %991 = vset.pattern.permute.xlu0 %v1054_v2  ;;  %901 = vmatprep.subr.mxu1 %v1055_v3  ;;  %v48_v4 = vld [vmem:[%s1324_s1 + $0x8] sm:$0xff] }
   0x2   :  { %43 = vperm.xlu0 %991, %v39_v0   ;;  %902 = vmatpush3.msk.msra.mxu1 %vm54_vm0, %v49_v1 }
   0x3   :  { %18 = vsyncpa [#allocation5], 0  ;;  %903 = vmatprep.subr.mxu1 %v1055_v3  ;;  %v47_v5 = vld [vmem:[%s1324_s1] sm:$0xff]  ;;  %vm1056_vm1 = vmmov 0   ;;  %920 = vmatprep.subr.mxu0 %v1055_v3  ;;  %v40_v6 = vlaneseq  ;;  %vm50_vm2 = vcmask 162816   ;;  %v1153_v15 = vld [vmem:[%s1325_s2 + $0x8] sm:$0xff] }
   0x4   :  { %907 = vmatprep.mubr.msk.f32.mxu1 %vm1056_vm1, %v1055_v3  ;;  %904 = vmatpush3.msra.mxu1 %v48_v4  ;;  %v128_v10 = vld [vmem:[%s1325_s2] sm:$0xff]  ;;  %vm134_vm4 = vcmask 261120   ;;  %v410_v59 = vld [vmem:[%s1327_s4 + $0x58] sm:$0xff]  ;;  %v409_v60 = vld [vmem:[%s1327_s4 + $0x50] sm:$0xff]  ;;  %vm187_vm5 = vcmask 64512   ;;  %vm396_vm6 = vcmask 1040384  }
   0x5   :  { %905 = vmatprep.subr.mxu1 %v1055_v3  ;;  %944 = vmatprep.mubr.msk.f32.mxu0 %vm1056_vm1, %v1055_v3  ;;  %v41_v7 = vand.u32 127, %v40_v6  ;;  %v130_v11 = vshrl.u32 %v40_v6, 7  ;;  %v408_v61 = vld [vmem:[%s1327_s4 + $0x48] sm:$0xff]  ;;  %v407_v62 = vld [vmem:[%s1327_s4 + $0x40] sm:$0xff]  ;;  %v406_v63 = vld [vmem:[%s1327_s4 + $0x38] sm:$0xff]  ;;  %s1058_s17 = smov 96  }
   0x6   :  { %906 = vmatpush3.msra.mxu1 %v47_v5  ;;  %921 = vmatpush3.xpose.msk.msra.mxu0 %vm134_vm4, %v410_v59  ;;  %v405_v0 = vld [vmem:[%s1327_s4 + $0x30] sm:$0xff]  ;;  %v404_v1 = vld [vmem:[%s1327_s4 + $0x28] sm:$0xff]  ;;  %v403_v2 = vld [vmem:[%s1327_s4 + $0x20] sm:$0xff]  ;;  %s1059_s20 = smov 32   ;;  %vm794_vm7 = vcmask 254976   ;;  %vm779_vm8 = vcmask 156672  }
   0x7   :  { %910 = vmatprep.subr.mxu1 %v1055_v3  ;;  %v131_v12 = vsub.s32 0, %v130_v11  ;;  %v265_v13 = vsub.s32 1, %v130_v11  ;;  %922 = vmatprep.subr.mxu0 %v1055_v3  ;;  %v402_v4 = vld [vmem:[%s1327_s4 + $0x18] sm:$0xff]  ;;  %v401_v5 = vld [vmem:[%s1327_s4 + $0x10] sm:$0xff]  ;;  %v419_v11 = vld [vmem:[%s1328_s5 + $0x40] sm:$0xff] }
   0xa   :  { %923 = vmatpush3.xpose.msk.msra.mxu0 %vm134_vm4, %v409_v60 }
   0xb   :  { %924 = vmatprep.subr.mxu0 %v1055_v3 }
   0xe   :  { %925 = vmatpush3.xpose.msk.msra.mxu0 %vm134_vm4, %v408_v61 }
   0xf   :  { %926 = vmatprep.subr.mxu0 %v1055_v3 }
  0x12   :  { %927 = vmatpush3.xpose.msk.msra.mxu0 %vm134_vm4, %v407_v62 }
  0x13   :  { %928 = vmatprep.subr.mxu0 %v1055_v3 }
  0x16   :  { %929 = vmatpush3.xpose.msk.msra.mxu0 %vm134_vm4, %v406_v63 }
  0x17   :  { %930 = vmatprep.subr.mxu0 %v1055_v3 }
  0x1a   :  { %931 = vmatpush3.xpose.msk.msra.mxu0 %vm134_vm4, %v405_v0 }
  0x1b   :  { %932 = vmatprep.subr.mxu0 %v1055_v3 }
  0x1e   :  { %933 = vmatpush3.xpose.msk.msra.mxu0 %vm134_vm4, %v404_v1 }
  0x1f   :  { %934 = vmatprep.subr.mxu0 %v1055_v3 }
  0x22   :  { %935 = vmatpush3.xpose.msk.msra.mxu0 %vm134_vm4, %v403_v2 }
  0x23   :  { %936 = vmatprep.subr.mxu0 %v1055_v3 }
  0x26   :  { %937 = vmatpush3.xpose.msk.msra.mxu0 %vm134_vm4, %v402_v4 }
  0x27   :  { %938 = vmatprep.subr.mxu0 %v1055_v3 }
  0x2a   :  { %939 = vmatpush3.xpose.msk.msra.mxu0 %vm134_vm4, %v401_v5 }
  0x2b   :  { %940 = vmatprep.subr.mxu0 %v1055_v3 }
  0x7d   :  { %v44_v8 = vpop.permute.xlu0 %43 }
  0x7e   :  { %vm45_vm3 = vcmp.eq.s32.totalorder %v44_v8, %v41_v7  ;;  %v422_v8 = vld [vmem:[%s1328_s5 + $0x58] sm:$0xff] }
  0x7f   :  { %v46_v9 = vsel %vm45_vm3, 1.0, %v1055_v3 }
  0x80   :  { %908 = vmatmul.mubr.msk.f32.vlgmr.msra.gmra.mxu1 %vm50_vm2, %v46_v9  ;;  %v421_v9 = vld [vmem:[%s1328_s5 + $0x50] sm:$0xff] }
  0x81   :  { %912 = vmatprep.mubr.msk.f32.mxu1 %vm1056_vm1, %v1055_v3  ;;  %911 = vmatpush3.msra.mxu1 %v128_v10 }
  0x82   :  { %915 = vmatprep.subr.mxu1 %v1055_v3 }
 0x140   :  { %v124_v14 = vpop.f32.mrf.mxu1 }
 0x141   :  { %v132_v16 = vrot.slane %v124_v14, %v131_v12  ;;  %v266_v17 = vrot.slane %v124_v14, %v265_v13  ;;  %v418_v12 = vld [vmem:[%s1328_s5 + $0x38] sm:$0xff]  ;;  %v417_v13 = vld [vmem:[%s1328_s5 + $0x30] sm:$0xff]  ;;  %v416_v14 = vld [vmem:[%s1328_s5 + $0x28] sm:$0xff] }
 0x142   :  { %v909_v18 = vpop.f32.mrf.mxu1 }
 0x143   :  { %v267_v19 = vmul.f32 %v1153_v15, %v266_v17  ;;  %v133_v20 = vmul.f32 %v132_v16, %v128_v10  ;;  %v420_v10 = vld [vmem:[%s1328_s5 + $0x48] sm:$0xff]  ;;  %v414_v16 = vld [vmem:[%s1328_s5 + $0x18] sm:$0xff]  ;;  %v413_v17 = vld [vmem:[%s1328_s5 + $0x10] sm:$0xff] }
 0x144   :  { %v412_v18 = vld [vmem:[%s1328_s5 + $0x8] sm:$0xff] }
 0x145   :  { %v268_v21 = vsel %vm134_vm4, %v267_v19, 0.0  ;;  %v135_v22 = vsel %vm134_vm4, %v133_v20, 0.0  ;;  %v411_v19 = vld [vmem:[%s1328_s5] sm:$0xff] }
 0x146   :  { %269 = vadd.xlane.f32.xlu1 %v268_v21  ;;  %136 = vadd.xlane.f32.xlu0 %v135_v22  ;;  %v425_v20 = vld [vmem:[%s1326_s3] sm:$0x3]  ;;  %v400_v21 = vld [vmem:[%s1327_s4 + $0x8] sm:$0xff] }
 0x147   :  { %941 = vmatpush3.xpose.msk.msra.mxu0 %vm134_vm4, %v400_v21  ;;  %v399_v22 = vld [vmem:[%s1327_s4] sm:$0xff]  ;;  %s1057_s4 = smov 64  }
 0x148   :  { %942 = vmatprep.subr.mxu0 %v1055_v3 }
 0x14b   :  { %943 = vmatpush3.xpose.msk.msra.mxu0 %vm134_vm4, %v399_v22 }
 0x14c   :  { %974 = vmatprep.subr.mxu0 %v1055_v3 }
 0x1cf   :  { %v270_v23 = vpop.xlane.xlu1 %269  ;;  %v137_v24 = vpop.xlane.xlu0 %136 }
 0x1d0   :  { %v271_v25 = vrot.slane %v270_v23, 4  ;;  %v138_v26 = vrot.slane %v137_v24, 4 }
 0x1d2   :  { %v272_v27 = vmax.f32 %v270_v23, %v271_v25  ;;  %v139_v28 = vmax.f32 %v137_v24, %v138_v26 }
 0x1d4   :  { %v273_v29 = vrot.slane %v272_v27, 2  ;;  %v140_v30 = vrot.slane %v139_v28, 2 }
 0x1d6   :  { %v274_v31 = vmax.f32 %v272_v27, %v273_v29  ;;  %v141_v32 = vmax.f32 %v139_v28, %v140_v30  ;;  %v843_v30 = vld [vmem:[%s1330_s7] ss:$0 sm:$0xff] }
 0x1d8   :  { %v275_v33 = vrot.slane %v274_v31, 1  ;;  %v142_v34 = vrot.slane %v141_v32, 1 }
 0x1da   :  { %v276_v35 = vmax.f32 %v274_v31, %v275_v33  ;;  %v143_v36 = vmax.f32 %v141_v32, %v142_v34  ;;  %v829_v34 = vld [vmem:[%s1329_s6] ss:$0 sm:$0xff] }
 0x1dc   :  { %v277_v37 = vsub.f32 %v270_v23, %v276_v35  ;;  %v144_v38 = vsub.f32 %v137_v24, %v143_v36 }
 0x1de   :  { %v278_v39 = vmul.f32 1.442695, %v277_v37  ;;  %v145_v40 = vmul.f32 1.442695, %v144_v38 }
 0x1e0   :  { %992 = vpow2.f32 %v278_v39 }
 0x1e1   :  { %994 = vpow2.f32 %v145_v40 }
 0x1ed   :  { %v993_v41 = vpop.eup %992 }
 0x1ee   :  { %v995_v42 = vpop.eup %994  ;;  %v280_v43 = vrot.slane %v993_v41, 4 }
 0x1ef   :  { %v147_v44 = vrot.slane %v995_v42, 4 }
 0x1f0   :  { %v281_v45 = vadd.f32 %v993_v41, %v280_v43 }
 0x1f1   :  { %v148_v46 = vadd.f32 %v995_v42, %v147_v44 }
 0x1f2   :  { %v282_v47 = vrot.slane %v281_v45, 2 }
 0x1f3   :  { %v149_v48 = vrot.slane %v148_v46, 2 }
 0x1f4   :  { %v283_v49 = vadd.f32 %v282_v47, %v281_v45  ;;  %v687_v47 = vld [vmem:[%s1331_s8 + $0x10] sm:$0xf] }
 0x1f5   :  { %v150_v50 = vadd.f32 %v149_v48, %v148_v46  ;;  %v686_v48 = vld [vmem:[%s1331_s8 + $0x8] sm:$0xff] }
 0x1f6   :  { %v284_v51 = vrot.slane %v283_v49, 1 }
 0x1f7   :  { %v151_v52 = vrot.slane %v150_v50, 1 }
 0x1f8   :  { %v285_v53 = vadd.f32 %v284_v51, %v283_v49 }
 0x1f9   :  { %v152_v54 = vadd.f32 %v151_v52, %v150_v50  ;;  %v685_v50 = vld [vmem:[%s1331_s8] sm:$0xff]  ;;  %s1060_s8 = smov [#allocation4]  }
 0x1fa   :  { %996 = vrcp.f32 %v285_v53  ;;  %s812_s0 = sshll.u32 %s1060_s8, 4  ;;  %s813_s0 = int_to_ptr.vmem [resolvable:$true] %s812_s0 }
 0x1fb   :  { %998 = vrcp.f32 %v152_v54  ;;  %s1010_s23 = scalar_lea.vmem %s813_s0, 32  ;;  %p1015_p1 = scmp.lt.s32.totalorder %s813_s0, %s813_s0 }
 0x1fc   :  { %p1011_p0 = scmp.ne.s32.totalorder %s813_s0, %s1010_s23  ;;  %p1016_p2 = scmp.lt.s32.totalorder %s1010_s23, %s1010_s23 }
 0x1fe   :  { %p1017_p3 = por %p1016_p2, %p1015_p1 }
 0x200   :  { %p1018_p4 = pnand %p1017_p3, %p1011_p0 }
 0x207   :  { %v997_v55 = vpop.eup %996 }
 0x208   :  { %v999_v56 = vpop.eup %998  ;;  %v287_v57 = vmul.f32 %v997_v55, %v993_v41 }
 0x209   :  { %v154_v58 = vmul.f32 %v999_v56, %v995_v42 }
 0x20a   :  { %288 = vxpose.xlu0.b32.start.end [1/1] (short) (narrow) %v287_v57, 8 }
 0x20b   :  { %155 = vxpose.xlu1.b32.start.end [1/1] (short) (narrow) %v154_v58, 8 }
 0x286   :  { %v304_v7 = vpop.trf.xlu0 }
 0x287   :  { %v171_v6 = vpop.trf.xlu1 }
 0x288   :  { %913 = vmatmul.mubr.msk.f32.vlgmr.msra.gmra.mxu1 %vm187_vm5, %v171_v6 }
 0x289   :  { %916 = vmatpush3.msra.mxu1 %v1153_v15  ;;  %917 = vmatprep.mubr.msk.f32.mxu1 %vm1056_vm1, %v1055_v3  ;;  %v415_v15 = vld [vmem:[%s1328_s5 + $0x20] sm:$0xff] }
 0x28a   :  { %947 = vmatprep.subr.mxu1 %v1055_v3 }
 0x28c   :  { %918 = vmatmul.mubr.msk.f32.vlgmr.msra.gmra.mxu1 %vm187_vm5, %v304_v7 }
 0x28d   :  { %948 = vmatpush3.xpose.msk.msra.mxu1 %vm134_vm4, %v422_v8  ;;  %971 = vmatprep.mubr.msk.f32.mxu1 %vm1056_vm1, %v1055_v3 }
 0x28e   :  { %949 = vmatprep.subr.mxu1 %v1055_v3 }
 0x291   :  { %950 = vmatpush3.xpose.msk.msra.mxu1 %vm134_vm4, %v421_v9 }
 0x292   :  { %951 = vmatprep.subr.mxu1 %v1055_v3 }
 0x295   :  { %952 = vmatpush3.xpose.msk.msra.mxu1 %vm134_vm4, %v420_v10 }
 0x296   :  { %953 = vmatprep.subr.mxu1 %v1055_v3 }
 0x299   :  { %954 = vmatpush3.xpose.msk.msra.mxu1 %vm134_vm4, %v419_v11 }
 0x29a   :  { %955 = vmatprep.subr.mxu1 %v1055_v3 }
 0x29d   :  { %956 = vmatpush3.xpose.msk.msra.mxu1 %vm134_vm4, %v418_v12 }
 0x29e   :  { %957 = vmatprep.subr.mxu1 %v1055_v3 }
 0x2a1   :  { %958 = vmatpush3.xpose.msk.msra.mxu1 %vm134_vm4, %v417_v13 }
 0x2a2   :  { %959 = vmatprep.subr.mxu1 %v1055_v3 }
 0x2a5   :  { %960 = vmatpush3.xpose.msk.msra.mxu1 %vm134_vm4, %v416_v14 }
 0x2a6   :  { %961 = vmatprep.subr.mxu1 %v1055_v3 }
 0x2a9   :  { %962 = vmatpush3.xpose.msk.msra.mxu1 %vm134_vm4, %v415_v15 }
 0x2aa   :  { %963 = vmatprep.subr.mxu1 %v1055_v3 }
 0x2ad   :  { %964 = vmatpush3.xpose.msk.msra.mxu1 %vm134_vm4, %v414_v16 }
 0x2ae   :  { %965 = vmatprep.subr.mxu1 %v1055_v3 }
 0x2b1   :  { %966 = vmatpush3.xpose.msk.msra.mxu1 %vm134_vm4, %v413_v17 }
 0x2b2   :  { %967 = vmatprep.subr.mxu1 %v1055_v3 }
 0x2b5   :  { %968 = vmatpush3.xpose.msk.msra.mxu1 %vm134_vm4, %v412_v18 }
 0x2b6   :  { %969 = vmatprep.subr.mxu1 %v1055_v3 }
 0x2b9   :  { %970 = vmatpush3.xpose.msk.msra.mxu1 %vm134_vm4, %v411_v19 }
 0x2bc   :  { %972 = vmatmul.mubr.msk.f32.vlgmr.msra.gmra.mxu1 %vm134_vm4, %v425_v20 }
 0x348   :  { %v257_v23 = vpop.f32.mrf.mxu1 }
 0x34a   :  { %v914_v24 = vpop.f32.mrf.mxu1 }
 0x34c   :  { %v389_v25 = vpop.f32.mrf.mxu1 }
 0x34d   :  { %v394_v26 = vrot.slane %v389_v25, 7 }
 0x34e   :  { %v919_v27 = vpop.f32.mrf.mxu1 }
 0x34f   :  { %v397_v28 = vsel %vm396_vm6, %v257_v23, %v394_v26 }
 0x350   :  { %v398_v29 = vmax.f32 %v397_v28, 0.0 }
 0x352   :  { %945 = vmatmul.mubr.msk.f32.vlgmr.msra.gmra.mxu0 %vm134_vm4, %v398_v29 }
 0x353   :  { %980 = vmatprep.mubr.msk.f32.mxu0 %vm1056_vm1, %v1055_v3  ;;  %975 = vmatpush3.xpose.msk.msra.mxu0 %vm134_vm4, %v687_v47 }
 0x354   :  { %976 = vmatprep.subr.mxu0 %v1055_v3 }
 0x357   :  { %977 = vmatpush3.xpose.msk.msra.mxu0 %vm134_vm4, %v686_v48 }
 0x358   :  { %978 = vmatprep.subr.mxu0 %v1055_v3  ;;  %v858_v3 = vld [vmem:[%s1332_s9] ss:$0 sm:$0xff] }
 0x35b   :  { %979 = vmatpush3.xpose.msk.msra.mxu0 %vm134_vm4, %v685_v50 }
 0x37c   :  { %v652_v31 = vpop.f32.mrf.mxu1 }
 0x37d   :  { %v653_v32 = vadd.f32 %v843_v30, %v652_v31 }
 0x37e   :  { %v973_v33 = vpop.f32.mrf.mxu1 }
 0x37f   :  { %664 = vrot.lane.b32.xlu1 %v653_v32, %s1057_s4 }
 0x3f1   :  { %v665_v42 = vpop.permute.xlu1 %664 }
 0x412   :  { %v537_v35 = vpop.f32.mrf.mxu0 }
 0x413   :  { %v538_v36 = vadd.f32 %v829_v34, %v537_v35 }
 0x414   :  { %v946_v37 = vpop.f32.mrf.mxu0 }
 0x415   :  { %v656_v38 = vadd.f32 %v653_v32, %v538_v36 }
 0x417   :  { %v857_v39 = vmul.f32 -1.442695, %v656_v38 }
 0x419   :  { %1000 = vpow2.f32 %v857_v39 }
 0x426   :  { %v1001_v40 = vpop.eup %1000 }
 0x427   :  { %v660_v41 = vadd.f32 1.0, %v1001_v40 }
 0x429   :  { %1002 = vrcp.f32 %v660_v41 }
 0x436   :  { %v1003_v43 = vpop.eup %1002 }
 0x437   :  { %v667_v44 = vmul.f32 %v1003_v43, %v665_v42  ;;  %v674_v52 = vsub.f32 1.0, %v1003_v43 }
 0x439   :  { %669 = vrot.lane.b32.xlu0 %v667_v44, %s1057_s4 }
 0x4ab   :  { %v670_v45 = vpop.permute.xlu0 %669 }
 0x4ac   :  { %v672_v46 = vadd.f32 %v670_v45, %v538_v36 }
 0x4ae   :  { %1004 = vtanh.f32 %v672_v46 }
 0x4bb   :  { %v1005_v49 = vpop.eup %1004 }
 0x4bc   :  { %676 = vrot.lane.b32.xlu1 %v1005_v49, %s1058_s17 }
 0x4c0   :  { %680 = vrot.lane.b32.xlu1 %v425_v20, %s1059_s20 }
 0x52e   :  { %v677_v51 = vpop.permute.xlu1 %676 }
 0x52f   :  { %v679_v54 = vmul.f32 %v677_v51, %v674_v52 }
 0x532   :  { %v681_v53 = vpop.permute.xlu1 %680 }
 0x533   :  { %v683_v55 = vmul.f32 %v1003_v43, %v681_v53 }
 0x535   :  { %v684_v56 = vadd.f32 %v683_v55, %v679_v54 }
 0x537   :  { %696 = vrot.lane.b32.xlu1 %v684_v56, %s1058_s17 }
 0x5a9   :  { %v697_v57 = vpop.permute.xlu1 %696 }
 0x5aa   :  { %981 = vmatmul.mubr.msk.f32.vlgmr.msra.gmra.mxu0 %vm134_vm4, %v697_v57  ;;  %795 = vst.msk [vmem:[#allocation4] sm:$0x3] %vm794_vm7, %v697_v57 }
 0x66a   :  { %v775_v58 = vpop.f32.mrf.mxu0 }
 0x66b   :  { %v776_v59 = vadd.f32 %v858_v3, %v775_v58 }
 0x66c   :  { %v982_v60 = vpop.f32.mrf.mxu0 }
 0x66d   :  { %v780_v61 = vsel %vm779_vm8, %v776_v59, -inf }
 0x66e   :  { %781 = vmax.xlane.f32.xlu1 %v780_v61 }
 0x6f7   :  { %v782_v62 = vpop.xlane.xlu1 %781 }
 0x6f8   :  { %v783_v63 = vsub.f32 %v776_v59, %v782_v62 }
 0x6fa   :  { %v784_v0 = vmul.f32 1.442695, %v783_v63 }
 0x6fc   :  { %1006 = vpow2.f32 %v784_v0 }
 0x709   :  { %v1007_v1 = vpop.eup %1006 }
 0x70a   :  { %v786_v2 = vsel %vm779_vm8, %v1007_v1, 0.0 }
 0x70b   :  { %787 = vadd.xlane.f32.xlu0 %v786_v2 }
 0x70c   :  { %1021 = shalt.err (!%p1018_p4)
}
 0x70d   :  { %815 = dma.vmem_to_hbm [thread:$0]  %s813_s0, 32, %s1334_s11, [#allocation5]  }
 0x70e   :  { %s1061_s24 = smov [#allocation2]  }
 0x70f   :  { %s802_s25 = sshll.u32 %s1061_s24, 4  ;;  %s803_s25 = int_to_ptr.vmem [resolvable:$true] %s802_s25 }
 0x710   :  { %s1030_s26 = scalar_lea.vmem %s803_s25, 32  ;;  %p1035_p6 = scmp.lt.s32.totalorder %s803_s25, %s803_s25 }
 0x711   :  { %p1031_p5 = scmp.ne.s32.totalorder %s803_s25, %s1030_s26  ;;  %p1036_p7 = scmp.lt.s32.totalorder %s1030_s26, %s1030_s26 }
 0x713   :  { %p1037_p8 = por %p1036_p7, %p1035_p6 }
 0x715   :  { %p1038_p9 = pnand %p1037_p8, %p1031_p5 }
 0x794   :  { %v788_v4 = vpop.xlane.xlu0 %787 }
 0x795   :  { %1008 = vlog2.f32 %v788_v4 }
 0x7a2   :  { %v1009_v5 = vpop.eup %1008 }
 0x7a3   :  { %v790_v6 = vmul.f32 0.6931472, %v1009_v5 }
 0x7a5   :  { %v791_v7 = vsub.f32 %v783_v63, %v790_v6 }
 0x7a7   :  { %792 = vst.msk [vmem:[#allocation2] sm:$0x3] %vm779_vm8, %v791_v7 }
 0x7a8   :  { %1041 = shalt.err (!%p1038_p9)
}
 0x7a9   :  { %805 = dma.vmem_to_hbm [thread:$0]  %s803_s25, 32, %s1333_s10, [#allocation3]  }
 0x7aa   :  { %1050 = dma.done.wait [#allocation3], 32  }
 0x7ab   :  { %1051 = vsyncadd [#allocation3], 4294967264 }
 0x7ac   :  { %1052 = dma.done.wait [#allocation5], 32  }
 0x7ad   :  { %1053 = vsyncadd [#allocation5], 4294967264 }
 0x7ae   :  { %822 = vsyncpa [#allocation3], 1 }
 0x7af   :  { %823 = vsyncpa [#allocation5], 1 }

</bundles_post_ra>
